<compile_context>
chip_gen: v7x
topology: tpu7x:2x2x1
jax: 0.10.0
libtpu: 0.0.40
codegen_flags: <defaults>
</compile_context>

<pallas_src>
import functools

import jax
import jax.numpy as jnp
from jax.experimental import pallas as pl
from jax.experimental.pallas import tpu as pltpu


def _round_up(x, m):
    return ((x + m - 1) // m) * m


def tagger_kernel(x_ref, tag_ref, w_ref, b_ref, logits_ref, part_ref,
                  *, num_tags, pad_tag_id):
    """Fused tag projection + logits store + CE-loss partials for one tile.

    x_ref      : (TN, D)      gathered embeddings (f32 or bf16)
    tag_ref    : (TN, 1)      int32 gold tags (sublane-oriented for the per-row
                              compare; 4*TN bytes/tile of reads — negligible)
    w_ref/b_ref: (D, Tp), (1, Tp)  tag projection, Tp = T padded to 128 lanes
    logits_ref : (TN, Tp)     f32 lane-dense output
    part_ref   : (1, 1, 128)  f32, lane0 = loss_sum, lane1 = valid count
    """
    tags = tag_ref[...]                                             # (TN, 1)
    tn, t_pad = logits_ref.shape

    # --- tag projection (MXU, f32 accumulate; elementwise math stays f32) ---
    logits = jnp.dot(x_ref[...].astype(w_ref.dtype), w_ref[...],
                     preferred_element_type=jnp.float32)
    logits = logits + b_ref[...].astype(jnp.float32)                # (TN, Tp)
    logits_ref[...] = logits                                        # lane-dense vst

    # Mask the zero-padded tag columns so they never contribute to the loss.
    lane = jax.lax.broadcasted_iota(jnp.int32, (tn, t_pad), 1)
    masked = jnp.where(lane < num_tags, logits, jnp.float32(-1e30))

    # --- CrossEntropy(ignore_index=pad_tag_id) partials ----------------------
    m = jnp.max(masked, axis=-1, keepdims=True)                     # (TN, 1)
    lse = m + jnp.log(jnp.sum(jnp.exp(masked - m), axis=-1, keepdims=True))
    tgt = jnp.sum(jnp.where(lane == tags, masked, 0.0),
                  axis=-1, keepdims=True)                           # (TN, 1)
    valid = (tags != pad_tag_id).astype(jnp.float32)                # (TN, 1)
    loss_sum = jnp.sum((lse - tgt) * valid)                         # scalar
    cnt = jnp.sum(valid)                                            # scalar

    # One vreg row of partials per tile: lane0 = loss_sum, lane1 = count.
    lane3 = jax.lax.broadcasted_iota(jnp.int32, (1, 1, 128), 2)
    part_ref[...] = jnp.where(lane3 == 0, loss_sum,
                              jnp.where(lane3 == 1, cnt, 0.0))


def simple_tagger_forward(token_ids, tag_ids, emb_table, w, b,
                          *, pad_token_id=0, pad_tag_id=0,
                          tile_n=2048, param_dtype=None):
    B, S = token_ids.shape
    V, D = emb_table.shape
    T = w.shape[1]
    N = B * S

    # `mask` only feeds the (stateful) metrics in the PyTorch module.
    _mask = token_ids != pad_token_id

    # Optional bf16 parameter path (halves HBM reads on v6e/v7x); the kernel
    # still accumulates in f32.  NOTE: this path loosens parity with an f32
    # reference beyond 1e-3.
    if param_dtype is not None:
        emb_table = emb_table.astype(param_dtype)
        w = w.astype(param_dtype)
        b = b.astype(param_dtype)

    T_pad = _round_up(T, 128)                  # lane-dense logits block
    TN = min(tile_n, _round_up(N, 8))          # tile rows (multiple of 8)
    if _round_up(N, TN) // TN < 2 and N > 8:
        # Give v7x's two TensorCores (megacore) at least two tiles to split.
        TN = _round_up((N + 1) // 2, 8)
    N_pad = _round_up(N, TN)
    num_tiles = N_pad // TN

    # --- embedding lookup: XLA's native TPU gather (no one-hot, any vocab) ---
    # TODO(synk): move into the kernel for full fusion (VMEM-resident table for
    #             small V, scalar-prefetch + DMA gather for large V).
    flat_tok = token_ids.reshape(N).astype(jnp.int32)
    x = jnp.take(emb_table, flat_tok, axis=0)                       # (N, D)
    x = jnp.pad(x, ((0, N_pad - N), (0, 0)))                        # pad rows: loss-masked

    if tag_ids is None:
        flat_tag = jnp.full((N,), pad_tag_id, jnp.int32)
    else:
        flat_tag = tag_ids.reshape(N).astype(jnp.int32)
    tag = jnp.full((N_pad, 1), pad_tag_id, jnp.int32).at[:N, 0].set(flat_tag)

    w_pad = jnp.zeros((D, T_pad), w.dtype).at[:, :T].set(w)
    b_pad = jnp.zeros((1, T_pad), b.dtype).at[:, :T].set(jnp.reshape(b, (1, T)))

    # VMEM budget from actual usage: 2x double-buffered per-tile blocks,
    # resident W/b, plus headroom for in-kernel f32 (TN, T_pad) temporaries.
    # Fits v7x's 64 MiB/TC as well as v5e/v6e's 128 MiB.
    x_item = jnp.dtype(x.dtype).itemsize
    w_item = jnp.dtype(w_pad.dtype).itemsize
    block_bytes = TN * D * x_item + TN * 4 + TN * T_pad * 4 + 128 * 4
    resident_bytes = (D + 1) * T_pad * w_item
    temp_bytes = 6 * TN * T_pad * 4
    vmem_limit = 2 * block_bytes + 2 * resident_bytes + temp_bytes + (2 << 20)
    vmem_limit = int(min(max(vmem_limit, 16 << 20), 40 << 20))

    kernel = functools.partial(tagger_kernel, num_tags=T, pad_tag_id=pad_tag_id)

    logits, partials = pl.pallas_call(
        kernel,
        grid=(num_tiles,),
        in_specs=[
            pl.BlockSpec((TN, D), lambda i: (i, 0)),        # gathered embeddings
            pl.BlockSpec((TN, 1), lambda i: (i, 0)),        # gold tag ids
            pl.BlockSpec((D, T_pad), lambda i: (0, 0)),     # W  (resident)
            pl.BlockSpec((1, T_pad), lambda i: (0, 0)),     # b  (resident)
        ],
        out_specs=(
            pl.BlockSpec((TN, T_pad), lambda i: (i, 0)),    # logits (lane-dense)
            pl.BlockSpec((1, 1, 128), lambda i: (i, 0, 0)), # per-tile loss partials
        ),
        out_shape=(
            jax.ShapeDtypeStruct((N_pad, T_pad), jnp.float32),
            jax.ShapeDtypeStruct((num_tiles, 1, 128), jnp.float32),
        ),
        compiler_params=pltpu.CompilerParams(
            dimension_semantics=("parallel",),
            vmem_limit_bytes=vmem_limit,
        ),
    )(x, tag, w_pad, b_pad)

    # Wrapper epilogue on the small (B, S, T) slab: softmax/argmax here are
    # trivial for XLA and keeping them out of the kernel halves its writeback.
    tag_logits = logits[:N, :T].reshape(B, S, T)
    out = {
        "pred_tag_ids": jnp.argmax(tag_logits, axis=-1).astype(jnp.int32),
        "tag_logits": tag_logits,
        "tag_probs": jax.nn.softmax(tag_logits, axis=-1),
    }
    if tag_ids is not None:
        # NaN if every tag equals pad_tag_id (matches CrossEntropyLoss with all
        # targets ignored).
        out["loss"] = partials[:, 0, 0].sum() / partials[:, 0, 1].sum()
    return out


def simple_tagger_reference(token_ids, tag_ids, emb_table, w, b, *, pad_tag_id=0):
    """Pure-JAX reference for correctness checking."""
    x = jnp.take(emb_table, token_ids, axis=0)                       # (B,S,D)
    logits = jnp.einsum("bsd,dt->bst", x, w) + b.reshape(-1)
    probs = jax.nn.softmax(logits, axis=-1)
    pred = jnp.argmax(logits, axis=-1)
    lse = jax.nn.logsumexp(logits, axis=-1)
    tgt = jnp.take_along_axis(logits, tag_ids[..., None], axis=-1)[..., 0]
    valid = (tag_ids != pad_tag_id).astype(jnp.float32)
    loss = jnp.sum((lse - tgt) * valid) / jnp.sum(valid)
    return logits, probs, pred, loss


if __name__ == "__main__":
    # Small synthetic shapes consistent with the module.
    B, S = 2, 8          # batch, sequence length
    V, D = 50, 32        # token vocab size, embedding dim
    T = 16               # num_tags
    PAD_TOKEN_ID = 0
    PAD_TAG_ID = 0

    key = jax.random.PRNGKey(0)
    k_emb, k_w, k_b, k_tok, k_tag = jax.random.split(key, 5)

    emb_table = jax.random.normal(k_emb, (V, D), dtype=jnp.float32) * 0.1
    w = jax.random.normal(k_w, (D, T), dtype=jnp.float32) * 0.1
    b = jax.random.normal(k_b, (1, T), dtype=jnp.float32) * 0.1

    token_ids = jax.random.randint(k_tok, (B, S), 0, V, dtype=jnp.int32)
    tag_ids = jax.random.randint(k_tag, (B, S), 0, T, dtype=jnp.int32)

    out = simple_tagger_forward(token_ids, tag_ids, emb_table, w, b,
                                pad_token_id=PAD_TOKEN_ID, pad_tag_id=PAD_TAG_ID)
    jax.block_until_ready(out)

    assert out["tag_logits"].shape == (B, S, T)
    assert out["tag_probs"].shape == (B, S, T)
    assert out["pred_tag_ids"].shape == (B, S)
    assert out["loss"].shape == ()

    # Correctness check against the pure-JAX reference.
    ref_logits, ref_probs, ref_pred, ref_loss = simple_tagger_reference(
        token_ids, tag_ids, emb_table, w, b, pad_tag_id=PAD_TAG_ID)
    assert jnp.allclose(out["tag_logits"], ref_logits, rtol=1e-3, atol=1e-3)
    assert jnp.allclose(out["tag_probs"], ref_probs, rtol=5e-3, atol=5e-3)
    assert bool((out["pred_tag_ids"] == ref_pred).all())
    assert jnp.allclose(out["loss"], ref_loss, rtol=1e-3, atol=1e-3)

    print("KERNEL_OK")
</pallas_src>

<mosaic_0001>
module attributes {stable_mosaic.version = 11 : i64} {
  func.func @tagger_kernel(%arg0: i32, %arg1: memref<8x32xf32, #tpu.memory_space<vmem>>, %arg2: memref<8x1xi32, #tpu.memory_space<vmem>>, %arg3: memref<32x128xf32, #tpu.memory_space<vmem>>, %arg4: memref<1x128xf32, #tpu.memory_space<vmem>>, %arg5: memref<8x128xf32, #tpu.memory_space<vmem>>, %arg6: memref<1x1x128xf32, #tpu.memory_space<vmem>>) attributes {dimension_semantics = [#tpu.dimension_semantics<parallel>], iteration_bounds = array<i64: 2>, scalar_prefetch = 0 : i64, scratch_operands = 0 : i64, tpu.core_type = #tpu.core_type<tc>, window_params = [{transform_indices = @transform_0, window_bounds = array<i64: 8, 32>}, {transform_indices = @transform_1, window_bounds = array<i64: 8, 1>}, {pipeline_mode = #tpu.pipeline_mode<synchronous>, transform_indices = @transform_2, window_bounds = array<i64: 32, 128>}, {pipeline_mode = #tpu.pipeline_mode<synchronous>, transform_indices = @transform_3, window_bounds = array<i64: 1, 128>}, {transform_indices = @transform_4, window_bounds = array<i64: 8, 128>}, {transform_indices = @transform_5, window_bounds = array<i64: 1, 1, 128>}]} {
    %c0 = arith.constant 0 : index
    %c0_0 = arith.constant 0 : index
    %0 = vector.load %arg2[%c0, %c0_0] : memref<8x1xi32, #tpu.memory_space<vmem>>, vector<8x1xi32>
    %c0_1 = arith.constant 0 : index
    %c0_2 = arith.constant 0 : index
    %1 = vector.load %arg1[%c0_1, %c0_2] : memref<8x32xf32, #tpu.memory_space<vmem>>, vector<8x32xf32>
    %c0_3 = arith.constant 0 : index
    %c0_4 = arith.constant 0 : index
    %2 = vector.load %arg3[%c0_3, %c0_4] : memref<32x128xf32, #tpu.memory_space<vmem>>, vector<32x128xf32>
    %cst = arith.constant dense<0.000000e+00> : vector<8x128xf32>
    %3 = tpu.matmul %1, %2, %cst {dimension_numbers = #tpu.dot_dimension_numbers<[1], [0], [0], [1], [0, 0, 1, 1], [], []>} : vector<8x32xf32>, vector<32x128xf32>, vector<8x128xf32> -> vector<8x128xf32>
    %c0_5 = arith.constant 0 : index
    %c0_6 = arith.constant 0 : index
    %4 = vector.load %arg4[%c0_5, %c0_6] : memref<1x128xf32, #tpu.memory_space<vmem>>, vector<1x128xf32>
    %5 = vector.broadcast %4 : vector<1x128xf32> to vector<8x128xf32>
    %6 = arith.addf %3, %5 : vector<8x128xf32>
    %c0_7 = arith.constant 0 : index
    %c0_8 = arith.constant 0 : index
    %7 = vector.load %arg5[%c0_7, %c0_8] : memref<8x128xf32, #tpu.memory_space<vmem>>, vector<8x128xf32>
    tpu.vector_store %arg5[%c0_7, %c0_8], %6 {strides = array<i32>} : memref<8x128xf32, #tpu.memory_space<vmem>>, vector<8x128xf32>,
    %8 = tpu.iota {dimensions = array<i32: 1>} : vector<8x128xi32>
    %c16_i32 = arith.constant 16 : i32
    %9 = vector.broadcast %c16_i32 : i32 to vector<8x128xi32>
    %10 = arith.cmpi slt, %8, %9 : vector<8x128xi32>
    %cst_9 = arith.constant -1.000000e+30 : f32
    %11 = vector.broadcast %cst_9 : f32 to vector<8x128xf32>
    %12 = arith.select %10, %6, %11 : vector<8x128xi1>, vector<8x128xf32>
    %cst_10 = arith.constant dense<0xFF800000> : vector<8xf32>
    %13 = vector.multi_reduction <maximumf>, %12, %cst_10 [1] : vector<8x128xf32> to vector<8xf32>
    %14 = vector.shape_cast %13 : vector<8xf32> to vector<8x1xf32>
    %15 = vector.broadcast %14 : vector<8x1xf32> to vector<8x128xf32>
    %16 = arith.subf %12, %15 : vector<8x128xf32>
    %17 = math.exp %16 : vector<8x128xf32>
    %cst_11 = arith.constant dense<0.000000e+00> : vector<8xf32>
    %18 = vector.multi_reduction <add>, %17, %cst_11 [1] : vector<8x128xf32> to vector<8xf32>
    %19 = vector.shape_cast %18 : vector<8xf32> to vector<8x1xf32>
    %20 = math.log %19 : vector<8x1xf32>
    %21 = arith.addf %14, %20 : vector<8x1xf32>
    %22 = vector.broadcast %0 : vector<8x1xi32> to vector<8x128xi32>
    %23 = arith.cmpi eq, %8, %22 : vector<8x128xi32>
    %cst_12 = arith.constant 0.000000e+00 : f32
    %24 = vector.broadcast %cst_12 : f32 to vector<8x128xf32>
    %25 = arith.select %23, %12, %24 : vector<8x128xi1>, vector<8x128xf32>
    %cst_13 = arith.constant dense<0.000000e+00> : vector<8xf32>
    %26 = vector.multi_reduction <add>, %25, %cst_13 [1] : vector<8x128xf32> to vector<8xf32>
    %27 = vector.shape_cast %26 : vector<8xf32> to vector<8x1xf32>
    %c0_i32 = arith.constant 0 : i32
    %28 = vector.broadcast %c0_i32 : i32 to vector<8x1xi32>
    %29 = arith.cmpi ne, %0, %28 : vector<8x1xi32>
    %30 = arith.extui %29 : vector<8x1xi1> to vector<8x1xi32>
    %31 = arith.sitofp %30 : vector<8x1xi32> to vector<8x1xf32>
    %32 = arith.subf %21, %27 : vector<8x1xf32>
    %33 = arith.mulf %32, %31 : vector<8x1xf32>
    %34 = vector.shape_cast %33 : vector<8x1xf32> to vector<1x8x1xf32>
    %cst_14 = arith.constant dense<0.000000e+00> : vector<1xf32>
    %35 = vector.multi_reduction <add>, %34, %cst_14 [1, 2] : vector<1x8x1xf32> to vector<1xf32>
    %36 = vector.shape_cast %35 : vector<1xf32> to vector<1x1x1xf32>
    %37 = vector.extract %36[0, 0, 0] : f32 from vector<1x1x1xf32>
    %38 = vector.shape_cast %31 : vector<8x1xf32> to vector<1x8x1xf32>
    %cst_15 = arith.constant dense<0.000000e+00> : vector<1xf32>
    %39 = vector.multi_reduction <add>, %38, %cst_15 [1, 2] : vector<1x8x1xf32> to vector<1xf32>
    %40 = vector.shape_cast %39 : vector<1xf32> to vector<1x1x1xf32>
    %41 = vector.extract %40[0, 0, 0] : f32 from vector<1x1x1xf32>
    %42 = tpu.iota {dimensions = array<i32: 2>} : vector<1x1x128xi32>
    %c0_i32_16 = arith.constant 0 : i32
    %43 = vector.broadcast %c0_i32_16 : i32 to vector<1x1x128xi32>
    %44 = arith.cmpi eq, %42, %43 : vector<1x1x128xi32>
    %c1_i32 = arith.constant 1 : i32
    %45 = vector.broadcast %c1_i32 : i32 to vector<1x1x128xi32>
    %46 = arith.cmpi eq, %42, %45 : vector<1x1x128xi32>
    %cst_17 = arith.constant 0.000000e+00 : f32
    %47 = vector.broadcast %41 : f32 to vector<1x1x128xf32>
    %48 = vector.broadcast %cst_17 : f32 to vector<1x1x128xf32>
    %49 = arith.select %46, %47, %48 : vector<1x1x128xi1>, vector<1x1x128xf32>
    %50 = vector.broadcast %37 : f32 to vector<1x1x128xf32>
    %51 = arith.select %44, %50, %49 : vector<1x1x128xi1>, vector<1x1x128xf32>
    %c0_18 = arith.constant 0 : index
    %c0_19 = arith.constant 0 : index
    %c0_20 = arith.constant 0 : index
    %52 = vector.load %arg6[%c0_18, %c0_19, %c0_20] : memref<1x1x128xf32, #tpu.memory_space<vmem>>, vector<1x1x128xf32>
    tpu.vector_store %arg6[%c0_18, %c0_19, %c0_20], %51 {strides = array<i32>} : memref<1x1x128xf32, #tpu.memory_space<vmem>>, vector<1x1x128xf32>,
    return
  }
  func.func @transform_0(%arg0: i32) -> (i32, i32) {
    %c0_i32 = arith.constant 0 : i32
    %c0_i32_0 = arith.constant 0 : i32
    return %arg0, %c0_i32 : i32, i32
  }
  func.func @transform_1(%arg0: i32) -> (i32, i32) {
    %c0_i32 = arith.constant 0 : i32
    %c0_i32_0 = arith.constant 0 : i32
    return %arg0, %c0_i32 : i32, i32
  }
  func.func @transform_2(%arg0: i32) -> (i32, i32) {
    %c0_i32 = arith.constant 0 : i32
    %c0_i32_0 = arith.constant 0 : i32
    %c0_i32_1 = arith.constant 0 : i32
    return %c0_i32, %c0_i32_0 : i32, i32
  }
  func.func @transform_3(%arg0: i32) -> (i32, i32) {
    %c0_i32 = arith.constant 0 : i32
    %c0_i32_0 = arith.constant 0 : i32
    %c0_i32_1 = arith.constant 0 : i32
    return %c0_i32, %c0_i32_0 : i32, i32
  }
  func.func @transform_4(%arg0: i32) -> (i32, i32) {
    %c0_i32 = arith.constant 0 : i32
    %c0_i32_0 = arith.constant 0 : i32
    return %arg0, %c0_i32 : i32, i32
  }
  func.func @transform_5(%arg0: i32) -> (i32, i32, i32) {
    %c0_i32 = arith.constant 0 : i32
    %c0_i32_0 = arith.constant 0 : i32
    %c0_i32_1 = arith.constant 0 : i32
    return %arg0, %c0_i32, %c0_i32_0 : i32, i32, i32
  }
}

</mosaic_0001>

<bundles_post_ra>
// kernel: tpu_custom_call.1
= control target key start
LH: loop header
LB: loop body
LE: loop exit
PB: predicated region body
PF: predicated region fallthrough
CT: control target
= control target key end

     0   :  { %11 = vsyncpa [#allocation3], 0  ;;  %s1005_s0 = inlined_call_operand.vmem [shape: f32[16,32], index: 0, kind: input, shape index: {}]   ;;  %s1006_s1 = inlined_call_operand.vmem [shape: s32[16,1], index: 1, kind: input, shape index: {}]   ;;  %s1007_s2 = inlined_call_operand.hbm [shape: f32[32,128], index: 2, kind: input, shape index: {}]   ;;  %s1008_s3 = inlined_call_operand.vmem [shape: f32[1,128], index: 3, kind: input, shape index: {}]   ;;  %s1009_s4 = inlined_call_operand.hbm [shape: f32[16,128], index: 4, kind: output, shape index: {0}]   ;;  %s1010_s5 = inlined_call_operand.hbm [shape: f32[2,1,128], index: 5, kind: output, shape index: {1}]  }
   0x1   :  { %12 = vsyncpa [#allocation4], 0 }
   0x2   :  { %14 = vsyncpa [#allocation4 + $0x1], 0 }
   0x3   :  { %15 = vsyncpa [#allocation7], 0 }
   0x4   :  { %17 = vsyncpa [#allocation7 + $0x1], 0  ;;  %s822_s18 = smov 0   ;;  %s824_s19 = smov 0  }
   0x5   :  { %s826_s20 = smov 0   ;;  %s828_s21 = smov 0  }
   0x6 LB: > { %s843_s22 = sadd.s32 4294967295, %s781_s21   ;;  %s546_s23 = sadd.s32 4294967294, %s781_s21   ;;  %s781_s21 = sphi %s828_s21, %s1026_s21   ;;  %s777_s20 = sphi %s826_s20, %s1025_s20   ;;  %s773_s19 = sphi %s824_s19, %s1024_s19   ;;  %s769_s18 = sphi %s822_s18, %s1023_s18  }
   0x7   : > { %s847_s24 = sadd.s32 1, %s781_s21   ;;  %s124_s25 = sadd.s32 1, %s777_s20 }
   0x8   : > { %s121_s26 = ssub.s32 %s781_s21, %s847_s24  ;;  %p134_p0 = scmp.ne.s32.totalorder %s777_s20, %s773_s19 }
   0x9   : > { %p122_p1 = scmp.eq.s32.totalorder %s121_s26, 0  ;;  %p135_p2 = scmp.eq.s32.totalorder %s843_s22, 1 }
   0xa   : > { %p140_p3 = scmp.ne.s32.totalorder %s773_s19, %s769_s18  ;;  %p141_p4 = scmp.eq.s32.totalorder %s546_s23, 1 }
   0xb   : > { %s858_s27 = scalar_select %p122_p1, %s777_s20, %s124_s25  }
   0xc   : > { %p860_p5 = por %p135_p2, %p134_p0  ;;  %p864_p6 = por %p141_p4, %p140_p3 }
   0xd   : > { %p547_p7 = scmp.ge.s32.totalorder %s781_s21, 1  ;;  %p174_p8 = scmp.lt.s32.totalorder %s781_s21, 3 }
   0xe   : > { %s1014_s28 = scalar_select %p860_p5, 1, 0 }
   0xf   : > { %s1015_s29 = scalar_select %p864_p6, 1, 0 }
  0x10   : > { %p1011_p9 = scmp.eq.s32.totalorder %s843_s22, 0  ;;  %p871_p10 = pnand %p547_p7, %p174_p8 }
  0x11   : > { %s783_s6 = smov [#allocation2]   ;;  %s655_s11 = scalar_lea.hbm %s1007_s2, 512 }
  0x12   : > { %s1016_s30 = scalar_select %p871_p10, 1, 0 }
  0x13   : > { %s186_s7 = sshll.u32 %s783_s6, 4  ;;  %p597_p11 = pneg %p871_p10  ;;  %s187_s7 = int_to_ptr.vmem [resolvable:$true] %s186_s7 }
  0x14   : > { %p656_p13 = scmp.ne.s32.totalorder %s1007_s2, %s655_s11  ;;  %p662_p3 = scmp.lt.u32.totalorder %s655_s11, %s1007_s2 }
  0x15   : > { %p879_p12 = pnand %p1011_p9, %p597_p11 }
  0x17   : > { %p657_p0 = pneg %p879_p12 }
  0x19   : > { %p658_p1 = pnand %p657_p0, %p656_p13 }
  0x1b   : > { %p659_p2 = pneg %p658_p1 }
  0x1d   : > { %p664_p4 = pnand %p662_p3, %p659_p2 }
  0x1f   : > { %667 = shalt.err (!%p664_p4)
}
  0x20   : > { %s668_s16 = scalar_lea.vmem %s187_s7, 512  ;;  %p676_p9 = scmp.lt.s32.totalorder %s187_s7, %s187_s7 }
  0x21   : > { %p669_p7 = scmp.ne.s32.totalorder %s187_s7, %s668_s16  ;;  %p677_p6 = scmp.lt.s32.totalorder %s668_s16, %s668_s16 }
  0x23   : > { %p671_p8 = pnand %p669_p7, %p657_p0  ;;  %p678_p5 = por %p677_p6, %p676_p9 }
  0x25   : > { %p672_p11 = pneg %p671_p8 }
  0x27   : > { %p679_p10 = pnand %p678_p5, %p672_p11 }
  0x29   : > { %682 = shalt.err (!%p679_p10)
}
  0x2a   : > { %s784_s17 = smov 128   ;;  %s785_s23 = smov 8  }
  0x2b   : > { %600 = dma.hbm_to_vmem [thread:$0]  (!%p879_p12), %s1007_s2, 512, %s187_s7, [#allocation3], %s784_s17, %s784_s17, %s785_s23  }
  0x2c   : > { %p1018_p13 = scmp.ne.s32.totalorder %s1016_s30, 0 }
  0x2d   : > { %p1019_p1 = scmp.eq.s32.totalorder (!%p1018_p13), %s843_s22, 0 }
  0x2e   : > { %219 = sbr.rel (%p1018_p13) target bundleno = 823 (0x337), region = 36 }
  0x35   : > { %756 = dma.done.wait (%p1019_p1), [#allocation3], 512   ;;  %p1020_p0 = pmov %p1019_p1 }
  0x36   : > { %p254_p5 = scmp.lt.s32.totalorder %s843_s22, 1  ;;  %v786_v0 = vmov 0.0|0.0   ;;  %vm787_vm0 = vmmov 0   ;;  %v788_v1 = vmov 0.0   ;;  %v264_v2 = vld [vmem:[#allocation2] sm:$0xff]  ;;  %v265_v3 = vld [vmem:[#allocation2 + $0x8] sm:$0xff]  ;;  %v350_v10 = vlaneseq }
  0x37   : > { %758 = vsyncadd (%p1020_p0), [#allocation3], 4294966784  ;;  %579 = vmatprep.subr.bf16.mxu0 %v786_v0  ;;  %576 = vmatprep.mubr.msk.f32.mxu0 %vm787_vm0, %v788_v1  ;;  %v266_v4 = vld [vmem:[#allocation2 + $0x10] sm:$0xff]  ;;  %v580_v5 = vpack.c.bf16 %v265_v3, %v264_v2  ;;  %v267_v6 = vld [vmem:[#allocation2 + $0x18] sm:$0xff]  ;;  %vm275_vm1 = vcmask 261120   ;;  %v789_v9 = vmov 0  }
  0x38   : > { %s907_s6 = scalar_select %p254_p5, %s843_s22, 1  ;;  %v583_v7 = vpack.c.bf16 %v267_v6, %v266_v4  ;;  %650 = vset.pattern.permute.xlu0 %v789_v9  ;;  %v916_v11 = vand.u32 127, %v350_v10  ;;  %v555_v12 = vld [vmem:[%s1008_s3] ss:$0 sm:$0xff]  ;;  %vm376_vm5 = vcmask 7168  }
  0x39   : > { %581 = vmatpush3.bf16.msra.mxu0 %v580_v5  ;;  %s914_s10 = sand.u32 1, %s773_s19   ;;  %s559_s23 = sshll.u32 %s843_s22, 7 }
  0x3a   : > { %s553_s30 = sshll.u32 %s907_s6, 3  ;;  %582 = vmatprep.subr.bf16.mxu0 %v786_v0  ;;  %s552_s11 = sshll.u32 %s914_s10, 3  ;;  %vm352_vm2 = vcmp.lt.s32.totalorder %v916_v11, 16 }
  0x3b   : > { %s257_s9 = scalar_lea.vmem %s1005_s0, %s553_s30  ;;  %s923_s14 = scalar_lea.vmem [#allocation5], %s552_s11 }
  0x3c   : > { %v263_v8 = vld [vmem:[%s257_s9] sm:$0xff]  ;;  %s261_s17 = scalar_lea.vmem %s1006_s1, %s553_s30  ;;  %s422_s25 = sshll.u32 %s923_s14, 4  ;;  %s423_s25 = int_to_ptr.vmem [resolvable:$true] %s422_s25 }
  0x3d   : > { %584 = vmatpush3.bf16.msra.mxu0 %v583_v7  ;;  %v262_v17 = vld [vmem:[%s261_s17] sm:$0xff]  ;;  %s935_s30 = scalar_lea.hbm %s1009_s4, %s559_s23  ;;  %s405_s7 = scalar_lea.sflag [#allocation4], %s914_s10 }
  0x3e   : > { %vm371_vm4 = vcmp.ne.s32.totalorder %v262_v17, 0  ;;  %s683_s8 = scalar_lea.vmem %s423_s25, 128  ;;  %p1021_p9 = scmp.ne.s32.totalorder %s1014_s28, 0 }
  0x3f   : > { %v557_v28 = vsel %vm371_vm4, 1.0, %v788_v1  ;;  %p684_p6 = scmp.ne.s32.totalorder %s423_s25, %s683_s8  ;;  %s790_s9 = smov [#allocation5]  }
  0x40   : > { %577 = vmatmul.mubr.msk.f32.vlgmr.msra.gmra.mrb[0].mxu0 %vm275_vm1, %v263_v8  ;;  %v387_v33 = vsel %vm376_vm5, %v557_v28, 0.0  ;;  %s687_s11 = sshll.u32 %s790_s9, 4  ;;  %s688_s11 = int_to_ptr.vmem [resolvable:$false] %s687_s11 }
  0x41   : > { %p685_p10 = pnand %p684_p6, %p1021_p9  ;;  %s689_s12 = scalar_lea.vmem %s688_s11, 256 }
  0x42   : > { %p690_p2 = scmp.lt.s32.totalorder %s423_s25, %s688_s11  ;;  %p691_p3 = scmp.lt.s32.totalorder %s689_s12, %s683_s8 }
  0x43   : > { %p686_p12 = pneg %p685_p10 }
  0x44   : > { %p692_p4 = por %p691_p3, %p690_p2 }
  0x46   : > { %p693_p7 = pnand %p692_p4, %p686_p12 }
 0x113   : > { %v345_v13 = vpop.f32.mrb[0].mxu0 }
 0x114   : > { %v346_v14 = vadd.f32 %v555_v12, %v345_v13  ;;  %v578_v15 = vpop.f32.mrb[1].mxu0 }
 0x116   : > { %349 = vst [vmem:[%s923_s14] sm:$0xff] %v346_v14  ;;  %v353_v16 = vsel %vm352_vm2, %v346_v14, -1e+30 }
 0x117   : > { %354 = vmax.xlane.f32.xlu0 %v353_v16 }
 0x12d   : > { %365 = vperm.xlu0 %650, %v262_v17  }
 0x1a4   : > { %v355_v18 = vpop.xlane.xlu0 %354 }
 0x1a5   : > { %v356_v19 = vsub.f32 %v353_v16, %v355_v18 }
 0x1a7   : > { %v357_v20 = vmul.f32 1.442695, %v356_v19 }
 0x1a9   : > { %651 = vpow2.f32 %v357_v20 }
 0x1ac   : > { %v366_v21 = vpop.permute.xlu0 %365 }
 0x1ad   : > { %vm367_vm3 = vcmp.eq.s32.totalorder %v916_v11, %v366_v21 }
 0x1ae   : > { %v368_v23 = vsel %vm367_vm3, %v353_v16, 0.0 }
 0x1b3   : > { %v652_v22 = vpop.eup %651 }
 0x1b4   : > { %359 = vadd.xlane.f32.xlu1 %v652_v22 }
 0x1b8   : > { %369 = vadd.xlane.f32.xlu1 %v368_v23 }
 0x241   : > { %v360_v24 = vpop.xlane.xlu1 %359 }
 0x242   : > { %653 = vlog2.f32 %v360_v24 }
 0x245   : > { %v370_v29 = vpop.xlane.xlu1 %369 }
 0x24c   : > { %v654_v25 = vpop.eup %653 }
 0x24d   : > { %v362_v26 = vmul.f32 0.6931472, %v654_v25 }
 0x24f   : > { %v363_v27 = vadd.f32 %v362_v26, %v355_v18 }
 0x251   : > { %v374_v30 = vsub.f32 %v363_v27, %v370_v29 }
 0x253   : > { %v375_v31 = vmul.f32 %v557_v28, %v374_v30 }
 0x255   : > { %v377_v32 = vsel %vm376_vm5, %v375_v31, 0.0 }
 0x256   : > { %378 = vadd.xlane.f32.xlu1 %v377_v32 }
 0x25a   : > { %388 = vadd.xlane.f32.xlu1 %v387_v33 }
 0x25b   : > { %696 = shalt.err (!%p693_p7)
}
 0x25c   : > { %s697_s13 = scalar_lea.hbm %s935_s30, 128  ;;  %s701_s16 = scalar_lea.hbm %s1009_s4, 256 }
 0x25d   : > { %p698_p8 = scmp.ne.s32.totalorder %s935_s30, %s697_s13  ;;  %p702_p1 = scmp.lt.u32.totalorder %s935_s30, %s1009_s4 }
 0x25e   : > { %p703_p0 = scmp.lt.u32.totalorder %s701_s16, %s697_s13  ;;  %p705_p6 = scmp.lt.u32.totalorder %s697_s13, %s935_s30 }
 0x25f   : > { %p699_p11 = pnand %p698_p8, %p1021_p9 }
 0x260   : > { %p704_p5 = por %p703_p0, %p702_p1 }
 0x261   : > { %p700_p13 = pneg %p699_p11 }
 0x262   : > { %p706_p10 = por %p705_p6, %p704_p5 }
 0x264   : > { %p707_p12 = pnand %p706_p10, %p700_p13 }
 0x266   : > { %710 = shalt.err (!%p707_p12)
}
 0x267   : > { %593 = dma.vmem_to_hbm [thread:$0]  (%p1021_p9), %s423_s25, 128, %s935_s30, %s405_s7   ;;  %vm398_vm6 = vcmp.eq.s32.totalorder %v916_v11, 1  ;;  %vm397_vm7 = vcmp.eq.s32.totalorder %v916_v11, 0 }
 0x268   : > { %s560_s25 = sshll.u32 %s843_s22, 4  ;;  %s253_s6 = scalar_lea.vmem [#allocation6], %s914_s10 }
 0x269   : > { %s435_s30 = sshll.u32 %s253_s6, 4  ;;  %s962_s11 = scalar_lea.hbm %s1010_s5, %s560_s25  ;;  %s964_s30 = int_to_ptr.vmem [resolvable:$true] %s435_s30 }
 0x26a   : > { %s410_s22 = scalar_lea.sflag [#allocation7], %s914_s10  ;;  %s711_s12 = scalar_lea.vmem %s964_s30, 16 }
 0x26b   : > { %p712_p2 = scmp.ne.s32.totalorder %s964_s30, %s711_s12  ;;  %s791_s13 = smov [#allocation6]  }
 0x26c   : > { %s715_s14 = sshll.u32 %s791_s13, 4  ;;  %s716_s14 = int_to_ptr.vmem [resolvable:$false] %s715_s14 }
 0x26d   : > { %p713_p3 = pnand %p712_p2, %p1021_p9  ;;  %s717_s15 = scalar_lea.vmem %s716_s14, 32 }
 0x26e   : > { %p718_p7 = scmp.lt.s32.totalorder %s964_s30, %s716_s14  ;;  %p719_p8 = scmp.lt.s32.totalorder %s717_s15, %s711_s12 }
 0x26f   : > { %p714_p4 = pneg %p713_p3 }
 0x270   : > { %p720_p11 = por %p719_p8, %p718_p7 }
 0x272   : > { %p721_p13 = pnand %p720_p11, %p714_p4 }
 0x2e3   : > { %v379_v34 = vpop.xlane.xlu1 %378 }
 0x2e4   : > { %v380_v35 = vrot.slane %v379_v34, 4 }
 0x2e6   : > { %v381_v36 = vadd.f32 %v380_v35, %v379_v34 }
 0x2e7   : > { %v389_v37 = vpop.xlane.xlu1 %388 }
 0x2e8   : > { %v382_v38 = vrot.slane %v381_v36, 2  ;;  %v390_v39 = vrot.slane %v389_v37, 4 }
 0x2ea   : > { %v391_v40 = vadd.f32 %v390_v39, %v389_v37  ;;  %v383_v41 = vadd.f32 %v382_v38, %v381_v36 }
 0x2ec   : > { %v392_v42 = vrot.slane %v391_v40, 2  ;;  %v384_v43 = vrot.slane %v383_v41, 1 }
 0x2ee   : > { %v393_v44 = vadd.f32 %v392_v42, %v391_v40  ;;  %v385_v45 = vadd.f32 %v384_v43, %v383_v41 }
 0x2f0   : > { %585 = vpush %v385_v45  ;;  %v394_v46 = vrot.slane %v393_v44, 1 }
 0x2f2   : > { %v395_v47 = vadd.f32 %v394_v46, %v393_v44 }
 0x2f4   : > { %587 = vpush %v395_v47 }
 0x321   : > { %s586_s26 = spop %585 }
 0x322   : > { %v401_v49 = vstv %s586_s26 }
 0x325   : > { %s588_s7 = spop %587 }
 0x326   : > { %v399_v48 = vstv %s588_s7 }
 0x327   : > { %v400_v50 = vsel %vm398_vm6, %v399_v48, 0.0 }
 0x328   : > { %v402_v51 = vsel %vm397_vm7, %v401_v49, %v400_v50 }
 0x329   : > { %403 = vst [vmem:[%s253_s6] sm:$0x1] %v402_v51 }
 0x32a   : > { %724 = shalt.err (!%p721_p13)
}
 0x32b   : > { %s725_s10 = scalar_lea.hbm %s962_s11, 16  ;;  %s729_s23 = scalar_lea.hbm %s1010_s5, 32 }
 0x32c   : > { %p726_p1 = scmp.ne.s32.totalorder %s962_s11, %s725_s10  ;;  %p730_p6 = scmp.lt.u32.totalorder %s962_s11, %s1010_s5 }
 0x32d   : > { %p731_p10 = scmp.lt.u32.totalorder %s729_s23, %s725_s10  ;;  %p733_p2 = scmp.lt.u32.totalorder %s725_s10, %s962_s11 }
 0x32e   : > { %p727_p0 = pnand %p726_p1, %p1021_p9 }
 0x32f   : > { %p732_p12 = por %p731_p10, %p730_p6 }
 0x330   : > { %p728_p5 = pneg %p727_p0 }
 0x331   : > { %p734_p3 = por %p733_p2, %p732_p12 }
 0x333   : > { %p735_p4 = pnand %p734_p3, %p728_p5 }
 0x335   : > { %738 = shalt.err (!%p735_p4)
}
 0x336   : > { %594 = dma.vmem_to_hbm [thread:$0]  (%p1021_p9), %s964_s30, 16, %s962_s11, %s410_s22  }
 0x337 PF: > { %p610_p7 = scmp.ge.s32.totalorder %s781_s21, 2  ;;  %s447_s6 = sand.u32 1, %s769_s18  }
 0x338   : > { %p1022_p8 = scmp.ne.s32.totalorder %s1015_s29, 0  ;;  %s448_s7 = scalar_lea.sflag [#allocation4], %s447_s6 }
 0x33a   : > { %p602_p11 = pnand %p610_p7, %p1022_p8 }
 0x33c   : > { %760 = dma.done.wait (!%p602_p11), %s448_s7, 128  }
 0x33d   : > { %762 = vsyncadd (!%p602_p11), %s448_s7, 4294967168  ;;  %s457_s8 = scalar_lea.sflag [#allocation7], %s447_s6 }
 0x33e   : > { %764 = dma.done.wait (!%p602_p11), %s457_s8, 16  }
 0x33f   : > { %766 = vsyncadd (!%p602_p11), %s457_s8, 4294967280  ;;  %p20_p9 = scmp.ge.s32.totalorder %s847_s24, 4   ;;  %s1023_s18 = smov %s773_s19 }
 0x340   : > { %s1024_s19 = smov %s777_s20  ;;  %s1025_s20 = smov %s858_s27 }
 0x341   : > { %s1026_s21 = smov %s847_s24  ;;  %22 = sbr.rel (!%p20_p9) target bundleno = 6 (0x6), region = 96 }
 0x348   :  { %461 = vsyncpa [#allocation3], 1 }
 0x349   :  { %463 = vsyncpa [#allocation3 + $0x1], 1 }
 0x34a   :  { %464 = vsyncpa [#allocation4], 1 }
 0x34b   :  { %466 = vsyncpa [#allocation4 + $0x1], 1 }
 0x34c   :  { %467 = vsyncpa [#allocation7], 1 }
 0x34d   :  { %469 = vsyncpa [#allocation7 + $0x1], 1 }

</bundles_post_ra>
